<compile_context>
chip_gen: v7x
topology: tpu7x:2x2x1
jax: 0.10.0
libtpu: 0.0.40
codegen_flags: <defaults>
</compile_context>

<pallas_src>
import jax
import jax.numpy as jnp
from jax.experimental import pallas as pl
from jax.experimental.pallas import tpu as pltpu


def _mlp_kernel(x_ref, w1_ref, b1_ref, w2_ref, b2_ref, out_ref):
    # fc1 on the MXU: cast the activation tile to bf16 in-kernel (no separate
    # XLA convert pass over x in HBM); accumulate in f32.
    x = x_ref[...].astype(jnp.bfloat16)                   # (TB, image_dim)
    h = jnp.dot(x, w1_ref[...],
                preferred_element_type=jnp.float32)       # (TB, hidden_dim) f32
    h = jnp.maximum(h + b1_ref[...], 0.0)                 # bias + ReLU (VPU)
    # dropout: identity in eval mode
    h = h.astype(jnp.bfloat16)                            # bf16 operands for fc2
    o = jnp.dot(h, w2_ref[...],
                preferred_element_type=jnp.float32)       # (TB, num_classes) f32
    out_ref[...] = o + b2_ref[...]


def _single_block_call(x, w1, b1, w2, b2):
    """Grid-less launch: whole arrays land in VMEM as single blocks."""
    B = x.shape[0]
    num_classes = w2.shape[1]
    return pl.pallas_call(
        _mlp_kernel,
        out_shape=jax.ShapeDtypeStruct((B, num_classes), jnp.float32),
        in_specs=[pl.BlockSpec(memory_space=pltpu.MemorySpace.VMEM)] * 5,
        out_specs=pl.BlockSpec(memory_space=pltpu.MemorySpace.VMEM),
        compiler_params=pltpu.CompilerParams(
            # explicit so 2K-row single blocks also fit v5e's 16 MiB scoped default
            vmem_limit_bytes=32 * 1024 * 1024,
        ),
    )(x, w1, b1, w2, b2)


def _grid_call(x, w1, b1, w2, b2, block_b, n_tiles):
    """Batch-grid launch over the first n_tiles*block_b rows of x (no copy of x)."""
    image_dim = x.shape[1]
    hidden_dim, num_classes = w2.shape
    return pl.pallas_call(
        _mlp_kernel,
        out_shape=jax.ShapeDtypeStruct((n_tiles * block_b, num_classes), jnp.float32),
        grid=(n_tiles,),
        in_specs=[
            pl.BlockSpec((block_b, image_dim), lambda i: (i, 0)),       # x tile streams
            pl.BlockSpec((image_dim, hidden_dim), lambda i: (0, 0)),    # w1 resident
            pl.BlockSpec((1, hidden_dim), lambda i: (0, 0)),            # b1 resident
            pl.BlockSpec((hidden_dim, num_classes), lambda i: (0, 0)),  # w2 resident
            pl.BlockSpec((1, num_classes), lambda i: (0, 0)),           # b2 resident
        ],
        out_specs=pl.BlockSpec((block_b, num_classes), lambda i: (i, 0)),
        compiler_params=pltpu.CompilerParams(
            dimension_semantics=("parallel",),   # v7x: shard batch tiles across 2 TCs
            vmem_limit_bytes=32 * 1024 * 1024,   # safe on v7x (64 MiB phys) and v5e/v6e
        ),
    )(x, w1, b1, w2, b2)


def _pick_block_b(B, max_block=2048):
    """Tile size: multiple of 256 (full MXU M on v6e/v7x), <= max_block,
    aiming for an even number of full tiles so v7x's 2 TensorCores split evenly."""
    n_tiles = -(-B // max_block)          # ceil
    if n_tiles % 2:
        n_tiles += 1
    bb = -(-B // n_tiles)                 # ceil
    bb = ((bb + 255) // 256) * 256        # round up to multiple of 256
    return max(256, min(bb, max_block))


def image_only_classifier_forward(image_embedding, text_embedding, params, *,
                                  block_b=None, single_block_rows=2048):
    """Pallas forward. text_embedding is accepted but unused (as in PyTorch)."""
    del text_embedding  # unused by the PyTorch forward

    w1 = params["w1"].astype(jnp.bfloat16)                 # (image_dim, hidden_dim)
    b1 = params["b1"].astype(jnp.float32).reshape(1, -1)   # (1, hidden_dim)
    w2 = params["w2"].astype(jnp.bfloat16)                 # (hidden_dim, num_classes)
    b2 = params["b2"].astype(jnp.float32).reshape(1, -1)   # (1, num_classes)

    x = image_embedding                                    # cast to bf16 inside the kernel
    B = x.shape[0]

    if B <= single_block_rows:
        # One-shot case: no grid, no pipelining machinery, no double buffering.
        return _single_block_call(x, w1, b1, w2, b2)

    if block_b is None:
        block_b = _pick_block_b(B)

    n_full = B // block_b
    prefix = n_full * block_b
    # Grid over the divisible prefix of the *unsliced* x (index_map only ever
    # touches full blocks, so no jnp.pad / x copy is needed).
    out_main = _grid_call(x, w1, b1, w2, b2, block_b, n_full)
    if prefix == B:
        return out_main
    # Ragged tail (< block_b rows): grid-less path; the slice copy is tiny.
    out_tail = _single_block_call(x[prefix:], w1, b1, w2, b2)
    return jnp.concatenate([out_main, out_tail], axis=0)


def init_params(key, image_dim=320, hidden_dim=512, num_classes=2):
    """Deterministic synthetic parameters (nn.Linear weights stored transposed: (in, out))."""
    k1, k2, k3, k4 = jax.random.split(key, 4)
    s1 = 1.0 / jnp.sqrt(image_dim)
    s2 = 1.0 / jnp.sqrt(hidden_dim)
    w1 = jax.random.uniform(k1, (image_dim, hidden_dim), jnp.float32, -s1, s1)
    b1 = jax.random.uniform(k2, (1, hidden_dim), jnp.float32, -s1, s1)
    w2 = jax.random.uniform(k3, (hidden_dim, num_classes), jnp.float32, -s2, s2)
    b2 = jax.random.uniform(k4, (1, num_classes), jnp.float32, -s2, s2)
    return {"w1": w1, "b1": b1, "w2": w2, "b2": b2}


def _reference(image_embedding, params):
    """Plain-JAX reference with the same bf16 rounding of matmul operands."""
    xb = image_embedding.astype(jnp.bfloat16).astype(jnp.float32)
    w1b = params["w1"].astype(jnp.bfloat16).astype(jnp.float32)
    w2b = params["w2"].astype(jnp.bfloat16).astype(jnp.float32)
    h = jnp.maximum(xb @ w1b + params["b1"].reshape(1, -1), 0.0)
    hb = h.astype(jnp.bfloat16).astype(jnp.float32)
    return hb @ w2b + params["b2"].reshape(1, -1)


if __name__ == "__main__":
    key = jax.random.PRNGKey(0)
    kp, kx1, kx2, kt = jax.random.split(key, 4)

    image_dim, hidden_dim, num_classes = 320, 512, 2
    params = init_params(kp, image_dim, hidden_dim, num_classes)

    # --- path 1: small batch -> grid-less single-block launch ---
    B_small = 8
    x_small = jax.random.normal(kx1, (B_small, image_dim), jnp.float32)
    text_small = jax.random.normal(kt, (B_small, 64), jnp.float32)  # unused, as in PyTorch
    out_small = jax.block_until_ready(
        image_only_classifier_forward(x_small, text_small, params))
    ref_small = _reference(x_small, params)
    assert out_small.shape == (B_small, num_classes)
    assert jnp.allclose(out_small, ref_small, atol=2e-2, rtol=2e-2)

    # --- path 2: batch grid + ragged tail (forced via small thresholds so the
    # grid path is exercised at small shapes: 3 full 64-row tiles + 8-row tail) ---
    B_big = 200
    x_big = jax.random.normal(kx2, (B_big, image_dim), jnp.float32)
    out_big = jax.block_until_ready(
        image_only_classifier_forward(x_big, None, params,
                                      block_b=64, single_block_rows=32))
    ref_big = _reference(x_big, params)
    assert out_big.shape == (B_big, num_classes)
    assert jnp.allclose(out_big, ref_big, atol=2e-2, rtol=2e-2)

    print("KERNEL_OK")
</pallas_src>

<mosaic_0001>
module attributes {stable_mosaic.version = 11 : i64} {
  func.func @_mlp_kernel(%arg0: memref<8x320xf32, #tpu.memory_space<vmem>>, %arg1: memref<320x512xbf16, #tpu.memory_space<vmem>>, %arg2: memref<1x512xf32, #tpu.memory_space<vmem>>, %arg3: memref<512x2xbf16, #tpu.memory_space<vmem>>, %arg4: memref<1x2xf32, #tpu.memory_space<vmem>>, %arg5: memref<8x2xf32, #tpu.memory_space<vmem>>) attributes {dimension_semantics = [], scalar_prefetch = 0 : i64, scratch_operands = 0 : i64, tpu.core_type = #tpu.core_type<tc>} {
    %c0 = arith.constant 0 : index
    %c0_0 = arith.constant 0 : index
    %0 = vector.load %arg0[%c0, %c0_0] : memref<8x320xf32, #tpu.memory_space<vmem>>, vector<8x320xf32>
    %1 = arith.truncf %0 : vector<8x320xf32> to vector<8x320xbf16>
    %c0_1 = arith.constant 0 : index
    %c0_2 = arith.constant 0 : index
    %2 = vector.load %arg1[%c0_1, %c0_2] : memref<320x512xbf16, #tpu.memory_space<vmem>>, vector<320x512xbf16>
    %cst = arith.constant dense<0.000000e+00> : vector<8x512xf32>
    %3 = tpu.matmul %1, %2, %cst {dimension_numbers = #tpu.dot_dimension_numbers<[1], [0], [0], [1], [0, 0, 1, 1], [], []>} : vector<8x320xbf16>, vector<320x512xbf16>, vector<8x512xf32> -> vector<8x512xf32>
    %c0_3 = arith.constant 0 : index
    %c0_4 = arith.constant 0 : index
    %4 = vector.load %arg2[%c0_3, %c0_4] : memref<1x512xf32, #tpu.memory_space<vmem>>, vector<1x512xf32>
    %5 = vector.broadcast %4 : vector<1x512xf32> to vector<8x512xf32>
    %6 = arith.addf %3, %5 : vector<8x512xf32>
    %cst_5 = arith.constant 0.000000e+00 : f32
    %7 = vector.broadcast %cst_5 : f32 to vector<8x512xf32>
    %8 = arith.maximumf %6, %7 : vector<8x512xf32>
    %9 = arith.truncf %8 : vector<8x512xf32> to vector<8x512xbf16>
    %c0_6 = arith.constant 0 : index
    %c0_7 = arith.constant 0 : index
    %10 = vector.load %arg3[%c0_6, %c0_7] : memref<512x2xbf16, #tpu.memory_space<vmem>>, vector<512x2xbf16>
    %cst_8 = arith.constant dense<0.000000e+00> : vector<8x2xf32>
    %11 = tpu.matmul %9, %10, %cst_8 {dimension_numbers = #tpu.dot_dimension_numbers<[1], [0], [0], [1], [0, 0, 1, 1], [], []>} : vector<8x512xbf16>, vector<512x2xbf16>, vector<8x2xf32> -> vector<8x2xf32>
    %c0_9 = arith.constant 0 : index
    %c0_10 = arith.constant 0 : index
    %12 = vector.load %arg4[%c0_9, %c0_10] : memref<1x2xf32, #tpu.memory_space<vmem>>, vector<1x2xf32>
    %13 = vector.broadcast %12 : vector<1x2xf32> to vector<8x2xf32>
    %14 = arith.addf %11, %13 : vector<8x2xf32>
    %c0_11 = arith.constant 0 : index
    %c0_12 = arith.constant 0 : index
    %15 = vector.load %arg5[%c0_11, %c0_12] : memref<8x2xf32, #tpu.memory_space<vmem>>, vector<8x2xf32>
    tpu.vector_store %arg5[%c0_11, %c0_12], %14 {strides = array<i32>} : memref<8x2xf32, #tpu.memory_space<vmem>>, vector<8x2xf32>,
    return
  }
}

</mosaic_0001>

<bundles_post_ra>
// kernel: tpu_custom_call.1
= control target key start
LH: loop header
LB: loop body
LE: loop exit
PB: predicated region body
PF: predicated region fallthrough
CT: control target
= control target key end

     0   :  { %10 = vsyncpa [#allocation3], 0  ;;  %s1420_s18 = smov [#allocation2]   ;;  %s1580_s0 = inlined_call_operand.vmem [shape: f32[8,320], index: 0, kind: input, shape index: {}]   ;;  %s1581_s1 = inlined_call_operand.hbm [shape: bf16[320,512], index: 1, kind: input, shape index: {}]   ;;  %s1582_s2 = inlined_call_operand.vmem [shape: f32[1,512], index: 2, kind: input, shape index: {}]   ;;  %s1583_s3 = inlined_call_operand.vmem [shape: bf16[512,2], index: 3, kind: input, shape index: {}]   ;;  %s1584_s4 = inlined_call_operand.vmem [shape: f32[1,2], index: 4, kind: input, shape index: {}]   ;;  %s1585_s5 = inlined_call_operand.vmem [shape: f32[8,2], index: 5, kind: output, shape index: {}]  }
   0x1   :  { %s18_s19 = sshll.u32 %s1420_s18, 4  ;;  %s1396_s22 = scalar_lea.hbm %s1581_s1, 10240  ;;  %s19_s19 = int_to_ptr.vmem [resolvable:$true] %s18_s19 }
   0x2   :  { %p1397_p0 = scmp.ne.s32.totalorder %s1581_s1, %s1396_s22  ;;  %p1400_p1 = scmp.lt.u32.totalorder %s1396_s22, %s1581_s1 }
   0x4   :  { %p1402_p2 = pnand %p1400_p1, %p1397_p0 }
   0x6   :  { %1405 = shalt.err (!%p1402_p2)
}
   0x7   :  { %s1406_s27 = scalar_lea.vmem %s19_s19, 10240  ;;  %p1411_p4 = scmp.lt.s32.totalorder %s19_s19, %s19_s19 }
   0x8   :  { %p1407_p3 = scmp.ne.s32.totalorder %s19_s19, %s1406_s27  ;;  %p1412_p5 = scmp.lt.s32.totalorder %s1406_s27, %s1406_s27 }
   0xa   :  { %p1413_p6 = por %p1412_p5, %p1411_p4 }
   0xc   :  { %p1414_p7 = pnand %p1413_p6, %p1407_p3 }
   0xe   :  { %1417 = shalt.err (!%p1414_p7)
}
   0xf   :  { %s1421_s28 = smov 256   ;;  %s1422_s29 = smov 16  }
  0x10   :  { %24 = dma.hbm_to_vmem [thread:$0]  %s1581_s1, 10240, %s19_s19, [#allocation3], %s1421_s28, %s1421_s28, %s1422_s29  }
  0x11   :  { %1418 = dma.done.wait [#allocation3], 10240  }
  0x12   :  { %1419 = vsyncadd [#allocation3], 4294957056  ;;  %v1244_v0 = vld [vmem:[#allocation2 + $0x4] ss:$16 sps:$4 sm:$0xff]   ;;  %v1246_v1 = vld [vmem:[#allocation2 + $0xc] ss:$16 sps:$4 sm:$0xff]  }
  0x13   :  { %547 = vmatprep.subr.bf16.mxu0 %v1244_v0  ;;  %v1248_v2 = vld [vmem:[#allocation2] ss:$16 sps:$4 sm:$0xff]   ;;  %v1249_v3 = vld [vmem:[#allocation2 + $0x8] ss:$16 sps:$4 sm:$0xff]   ;;  %629 = vmatprep.subr.bf16.mxu1 %v1246_v1  ;;  %v1250_v4 = vld [vmem:[#allocation2 + $0x24] ss:$16 sps:$4 sm:$0xff]  }
  0x14   :  { %548 = vmatpush1.bf16.msra.mxu0 %v1248_v2  ;;  %630 = vmatpush1.bf16.msra.mxu1 %v1249_v3  ;;  %v1252_v5 = vld [vmem:[#allocation2 + $0x2c] ss:$16 sps:$4 sm:$0xff]   ;;  %v1254_v6 = vld [vmem:[#allocation2 + $0x20] ss:$16 sps:$4 sm:$0xff]   ;;  %v1255_v7 = vld [vmem:[#allocation2 + $0x28] ss:$16 sps:$4 sm:$0xff]  }
  0x15   :  { %549 = vmatprep.subr.bf16.mxu0 %v1250_v4  ;;  %631 = vmatprep.subr.bf16.mxu1 %v1252_v5  ;;  %v1256_v8 = vld [vmem:[#allocation2 + $0x44] ss:$16 sps:$4 sm:$0xff]   ;;  %v1258_v9 = vld [vmem:[#allocation2 + $0x4c] ss:$16 sps:$4 sm:$0xff]   ;;  %v1260_v10 = vld [vmem:[#allocation2 + $0x40] ss:$16 sps:$4 sm:$0xff]  }
  0x16   :  { %v1261_v11 = vld [vmem:[#allocation2 + $0x48] ss:$16 sps:$4 sm:$0xff]   ;;  %v1262_v12 = vld [vmem:[#allocation2 + $0x64] ss:$16 sps:$4 sm:$0xff]   ;;  %v1264_v13 = vld [vmem:[#allocation2 + $0x6c] ss:$16 sps:$4 sm:$0xff]  }
  0x17   :  { %v1266_v14 = vld [vmem:[#allocation2 + $0x60] ss:$16 sps:$4 sm:$0xff]   ;;  %v1267_v15 = vld [vmem:[#allocation2 + $0x68] ss:$16 sps:$4 sm:$0xff]   ;;  %v1268_v16 = vld [vmem:[#allocation2 + $0x84] ss:$16 sps:$4 sm:$0xff]  }
  0x18   :  { %550 = vmatpush1.bf16.msra.mxu0 %v1254_v6  ;;  %632 = vmatpush1.bf16.msra.mxu1 %v1255_v7  ;;  %v1270_v17 = vld [vmem:[#allocation2 + $0x8c] ss:$16 sps:$4 sm:$0xff]   ;;  %v1272_v18 = vld [vmem:[#allocation2 + $0x80] ss:$16 sps:$4 sm:$0xff]   ;;  %v1273_v19 = vld [vmem:[#allocation2 + $0x88] ss:$16 sps:$4 sm:$0xff]  }
  0x19   :  { %551 = vmatprep.subr.bf16.mxu0 %v1256_v8  ;;  %633 = vmatprep.subr.bf16.mxu1 %v1258_v9  ;;  %v1274_v20 = vld [vmem:[#allocation2 + $0xa4] ss:$16 sps:$4 sm:$0xff]   ;;  %v1276_v21 = vld [vmem:[#allocation2 + $0xac] ss:$16 sps:$4 sm:$0xff]   ;;  %v1278_v22 = vld [vmem:[#allocation2 + $0xa0] ss:$16 sps:$4 sm:$0xff]  }
  0x1a   :  { %v1279_v23 = vld [vmem:[#allocation2 + $0xa8] ss:$16 sps:$4 sm:$0xff]   ;;  %v1280_v24 = vld [vmem:[#allocation2 + $0xc4] ss:$16 sps:$4 sm:$0xff]   ;;  %v1282_v25 = vld [vmem:[#allocation2 + $0xcc] ss:$16 sps:$4 sm:$0xff]  }
  0x1b   :  { %v1284_v26 = vld [vmem:[#allocation2 + $0xc0] ss:$16 sps:$4 sm:$0xff]   ;;  %v1285_v27 = vld [vmem:[#allocation2 + $0xc8] ss:$16 sps:$4 sm:$0xff]   ;;  %v1286_v28 = vld [vmem:[#allocation2 + $0xe4] ss:$16 sps:$4 sm:$0xff]  }
  0x1c   :  { %552 = vmatpush1.bf16.msra.mxu0 %v1260_v10  ;;  %634 = vmatpush1.bf16.msra.mxu1 %v1261_v11  ;;  %v1288_v29 = vld [vmem:[#allocation2 + $0xec] ss:$16 sps:$4 sm:$0xff]   ;;  %v1290_v30 = vld [vmem:[#allocation2 + $0xe0] ss:$16 sps:$4 sm:$0xff]   ;;  %v1291_v31 = vld [vmem:[#allocation2 + $0xe8] ss:$16 sps:$4 sm:$0xff]  }
  0x1d   :  { %553 = vmatprep.subr.bf16.mxu0 %v1262_v12  ;;  %635 = vmatprep.subr.bf16.mxu1 %v1264_v13  ;;  %v1292_v32 = vld [vmem:[#allocation2 + $0x104] ss:$16 sps:$4 sm:$0xff]   ;;  %v1294_v33 = vld [vmem:[#allocation2 + $0x10c] ss:$16 sps:$4 sm:$0xff]   ;;  %v1296_v34 = vld [vmem:[#allocation2 + $0x100] ss:$16 sps:$4 sm:$0xff]  }
  0x1e   :  { %v1297_v35 = vld [vmem:[#allocation2 + $0x108] ss:$16 sps:$4 sm:$0xff]   ;;  %v1298_v36 = vld [vmem:[#allocation2 + $0x124] ss:$16 sps:$4 sm:$0xff]   ;;  %v1300_v37 = vld [vmem:[#allocation2 + $0x12c] ss:$16 sps:$4 sm:$0xff]  }
  0x1f   :  { %v1302_v38 = vld [vmem:[#allocation2 + $0x120] ss:$16 sps:$4 sm:$0xff]   ;;  %v1303_v39 = vld [vmem:[#allocation2 + $0x128] ss:$16 sps:$4 sm:$0xff]   ;;  %v1304_v40 = vld [vmem:[#allocation2 + $0x144] ss:$16 sps:$4 sm:$0xff]  }
  0x20   :  { %554 = vmatpush1.bf16.msra.mxu0 %v1266_v14  ;;  %636 = vmatpush1.bf16.msra.mxu1 %v1267_v15  ;;  %v1306_v41 = vld [vmem:[#allocation2 + $0x14c] ss:$16 sps:$4 sm:$0xff]   ;;  %v1308_v42 = vld [vmem:[#allocation2 + $0x140] ss:$16 sps:$4 sm:$0xff]   ;;  %v1309_v43 = vld [vmem:[#allocation2 + $0x148] ss:$16 sps:$4 sm:$0xff]  }
  0x21   :  { %555 = vmatprep.subr.bf16.mxu0 %v1268_v16  ;;  %637 = vmatprep.subr.bf16.mxu1 %v1270_v17  ;;  %v1310_v44 = vld [vmem:[#allocation2 + $0x164] ss:$16 sps:$4 sm:$0xff]   ;;  %v1312_v45 = vld [vmem:[#allocation2 + $0x16c] ss:$16 sps:$4 sm:$0xff]   ;;  %v1314_v47 = vld [vmem:[#allocation2 + $0x160] ss:$16 sps:$4 sm:$0xff]  }
  0x22   :  { %v36_v46 = vld [vmem:[%s1580_s0 + $0x8] sm:$0xff]  ;;  %v1316_v50 = vld [vmem:[#allocation2 + $0x184] ss:$16 sps:$4 sm:$0xff]   ;;  %v1320_v52 = vld [vmem:[#allocation2 + $0x180] ss:$16 sps:$4 sm:$0xff]   ;;  %v1423_v15 = vmov 0  }
  0x23   :  { %v39_v48 = vpack.c.bf16 %v36_v46, %v36_v46  ;;  %v1315_v49 = vld [vmem:[#allocation2 + $0x168] ss:$16 sps:$4 sm:$0xff]   ;;  %v1318_v51 = vld [vmem:[#allocation2 + $0x18c] ss:$16 sps:$4 sm:$0xff]   ;;  %v1322_v54 = vld [vmem:[#allocation2 + $0x1a4] ss:$16 sps:$4 sm:$0xff]  }
  0x24   :  { %556 = vmatpush1.bf16.msra.mxu0 %v1272_v18  ;;  %638 = vmatpush1.bf16.msra.mxu1 %v1273_v19  ;;  %v1321_v53 = vld [vmem:[#allocation2 + $0x188] ss:$16 sps:$4 sm:$0xff]   ;;  %v1324_v55 = vld [vmem:[#allocation2 + $0x1ac] ss:$16 sps:$4 sm:$0xff]   ;;  %v1326_v56 = vld [vmem:[#allocation2 + $0x1a0] ss:$16 sps:$4 sm:$0xff]  }
  0x25   :  { %557 = vmatprep.subr.bf16.mxu0 %v1274_v20  ;;  %639 = vmatprep.subr.bf16.mxu1 %v1276_v21  ;;  %v1327_v57 = vld [vmem:[#allocation2 + $0x1a8] ss:$16 sps:$4 sm:$0xff]   ;;  %v1328_v58 = vld [vmem:[#allocation2 + $0x1c4] ss:$16 sps:$4 sm:$0xff]   ;;  %v1330_v59 = vld [vmem:[#allocation2 + $0x1cc] ss:$16 sps:$4 sm:$0xff]  }
  0x26   :  { %579 = vmatprep.mubr.bf16.mxu0 %v39_v48  ;;  %661 = vmatprep.mubr.bf16.mxu1 %v39_v48  ;;  %v1332_v60 = vld [vmem:[#allocation2 + $0x1c0] ss:$16 sps:$4 sm:$0xff]   ;;  %v1333_v61 = vld [vmem:[#allocation2 + $0x1c8] ss:$16 sps:$4 sm:$0xff]   ;;  %v1334_v62 = vld [vmem:[#allocation2 + $0x1e4] ss:$16 sps:$4 sm:$0xff]  }
  0x27   :  { %v1336_v63 = vld [vmem:[#allocation2 + $0x1ec] ss:$16 sps:$4 sm:$0xff]   ;;  %v1338_v0 = vld [vmem:[#allocation2 + $0x1e0] ss:$16 sps:$4 sm:$0xff]   ;;  %v1339_v1 = vld [vmem:[#allocation2 + $0x1e8] ss:$16 sps:$4 sm:$0xff]  }
  0x28   :  { %558 = vmatpush1.bf16.msra.mxu0 %v1278_v22  ;;  %640 = vmatpush1.bf16.msra.mxu1 %v1279_v23  ;;  %v1342_v2 = vld [vmem:[#allocation2 + $0x204] ss:$16 sps:$4 sm:$0xff]   ;;  %v1345_v4 = vld [vmem:[#allocation2 + $0x20c] ss:$16 sps:$4 sm:$0xff]   ;;  %v1340_v5 = vld [vmem:[#allocation2 + $0x200] ss:$16 sps:$4 sm:$0xff]  }
  0x29   :  { %559 = vmatprep.subr.bf16.mxu0 %v1280_v24  ;;  %641 = vmatprep.subr.bf16.mxu1 %v1282_v25  ;;  %v35_v3 = vld [vmem:[%s1580_s0] sm:$0xff]  ;;  %v1343_v6 = vld [vmem:[#allocation2 + $0x208] ss:$16 sps:$4 sm:$0xff]   ;;  %v1351_v9 = vld [vmem:[#allocation2 + $0x22c] ss:$16 sps:$4 sm:$0xff]   ;;  %vm543_vm0 = vcmask 523264  }
  0x2a   :  { %v38_v7 = vpack.c.bf16 %v35_v3, %v35_v3  ;;  %v1348_v8 = vld [vmem:[#allocation2 + $0x224] ss:$16 sps:$4 sm:$0xff]   ;;  %v1346_v10 = vld [vmem:[#allocation2 + $0x220] ss:$16 sps:$4 sm:$0xff]   ;;  %v1349_v11 = vld [vmem:[#allocation2 + $0x228] ss:$16 sps:$4 sm:$0xff]  }
  0x2b   :  { %v1354_v12 = vld [vmem:[#allocation2 + $0x244] ss:$16 sps:$4 sm:$0xff]   ;;  %v1357_v13 = vld [vmem:[#allocation2 + $0x24c] ss:$16 sps:$4 sm:$0xff]   ;;  %v1352_v14 = vld [vmem:[#allocation2 + $0x240] ss:$16 sps:$4 sm:$0xff]  }
  0x2c   :  { %560 = vmatpush1.bf16.msra.mxu0 %v1284_v26  ;;  %642 = vmatpush1.bf16.msra.mxu1 %v1285_v27  ;;  %v1355_v16 = vld [vmem:[#allocation2 + $0x248] ss:$16 sps:$4 sm:$0xff]   ;;  %v1360_v17 = vld [vmem:[#allocation2 + $0x264] ss:$16 sps:$4 sm:$0xff]   ;;  %v1363_v18 = vld [vmem:[#allocation2 + $0x26c] ss:$16 sps:$4 sm:$0xff]  }
  0x2d   :  { %561 = vmatprep.subr.bf16.mxu0 %v1286_v28  ;;  %643 = vmatprep.subr.bf16.mxu1 %v1288_v29  ;;  %v1358_v19 = vld [vmem:[#allocation2 + $0x260] ss:$16 sps:$4 sm:$0xff]   ;;  %v1361_v20 = vld [vmem:[#allocation2 + $0x268] ss:$16 sps:$4 sm:$0xff]   ;;  %vm1062_vm1 = vcmask 15360  }
  0x2e   :  { %v37_v21 = vld [vmem:[%s1580_s0 + $0x10] sm:$0xff]  ;;  %v1364_v22 = vld [vmem:[%s1583_s3 + $0x40] sm:$0xff]   ;;  %v1368_v27 = vld [vmem:[%s1583_s3 + $0x48] sm:$0xff]  }
  0x2f   :  { %v1365_v23 = vld [vmem:[%s1583_s3 + $0xc0] sm:$0xff]   ;;  %v40_v26 = vpack.c.bf16 %v37_v21, %v37_v21  ;;  %v1369_v28 = vld [vmem:[%s1583_s3 + $0xc8] sm:$0xff]   ;;  %v1389_v48 = vld [vmem:[%s1583_s3 + $0xf0] sm:$0xff]  }
  0x30   :  { %562 = vmatpush1.bf16.msra.mxu0 %v1290_v30  ;;  %644 = vmatpush1.bf16.msra.mxu1 %v1291_v31  ;;  %v1366_v24 = vld [vmem:[%s1583_s3] sm:$0xff]   ;;  %v1370_v29 = vld [vmem:[%s1583_s3 + $0x8] sm:$0xff]   ;;  %v1372_v31 = vld [vmem:[%s1583_s3 + $0x50] sm:$0xff]  }
  0x31   :  { %563 = vmatprep.subr.bf16.mxu0 %v1292_v32  ;;  %645 = vmatprep.subr.bf16.mxu1 %v1294_v33  ;;  %v1367_v25 = vld [vmem:[%s1583_s3 + $0x80] sm:$0xff]   ;;  %v1371_v30 = vld [vmem:[%s1583_s3 + $0x88] sm:$0xff]   ;;  %v1373_v32 = vld [vmem:[%s1583_s3 + $0xd0] sm:$0xff]  }
  0x32   :  { %v1374_v33 = vld [vmem:[%s1583_s3 + $0x10] sm:$0xff]   ;;  %v1387_v46 = vld [vmem:[%s1583_s3 + $0xa8] sm:$0xff]  }
  0x34   :  { %564 = vmatpush1.bf16.msra.mxu0 %v1296_v34  ;;  %646 = vmatpush1.bf16.msra.mxu1 %v1297_v35  ;;  %v1375_v34 = vld [vmem:[%s1583_s3 + $0x90] sm:$0xff]   ;;  %v1376_v35 = vld [vmem:[%s1583_s3 + $0x58] sm:$0xff]  }
  0x35   :  { %565 = vmatprep.subr.bf16.mxu0 %v1298_v36  ;;  %647 = vmatprep.subr.bf16.mxu1 %v1300_v37  ;;  %v1377_v36 = vld [vmem:[%s1583_s3 + $0xd8] sm:$0xff]  }
  0x36   :  { %v1378_v37 = vld [vmem:[%s1583_s3 + $0x18] sm:$0xff]  }
  0x38   :  { %566 = vmatpush1.bf16.msra.mxu0 %v1302_v38  ;;  %648 = vmatpush1.bf16.msra.mxu1 %v1303_v39  ;;  %v1379_v38 = vld [vmem:[%s1583_s3 + $0x98] sm:$0xff]   ;;  %v1380_v39 = vld [vmem:[%s1583_s3 + $0x60] sm:$0xff]  }
  0x39   :  { %567 = vmatprep.subr.bf16.mxu0 %v1304_v40  ;;  %649 = vmatprep.subr.bf16.mxu1 %v1306_v41  ;;  %v1381_v40 = vld [vmem:[%s1583_s3 + $0xe0] sm:$0xff]  }
  0x3a   :  { %v1382_v41 = vld [vmem:[%s1583_s3 + $0x20] sm:$0xff]  }
  0x3c   :  { %568 = vmatpush1.bf16.msra.mxu0 %v1308_v42  ;;  %650 = vmatpush1.bf16.msra.mxu1 %v1309_v43  ;;  %v1383_v42 = vld [vmem:[%s1583_s3 + $0xa0] sm:$0xff]   ;;  %v1384_v43 = vld [vmem:[%s1583_s3 + $0x68] sm:$0xff]  }
  0x3d   :  { %569 = vmatprep.subr.bf16.mxu0 %v1310_v44  ;;  %651 = vmatprep.subr.bf16.mxu1 %v1312_v45  ;;  %v1385_v44 = vld [vmem:[%s1583_s3 + $0xe8] sm:$0xff]  }
  0x3e   :  { %v1386_v45 = vld [vmem:[%s1583_s3 + $0x28] sm:$0xff]  }
  0x40   :  { %570 = vmatpush1.bf16.msra.mxu0 %v1314_v47  ;;  %652 = vmatpush1.bf16.msra.mxu1 %v1315_v49  ;;  %v1388_v47 = vld [vmem:[%s1583_s3 + $0x70] sm:$0xff]  }
  0x41   :  { %571 = vmatprep.subr.bf16.mxu0 %v1316_v50  ;;  %653 = vmatprep.subr.bf16.mxu1 %v1318_v51  ;;  %v1390_v49 = vld [vmem:[%s1583_s3 + $0x30] sm:$0xff]   ;;  %v1392_v51 = vld [vmem:[%s1583_s3 + $0x78] sm:$0xff]  }
  0x42   :  { %v1391_v50 = vld [vmem:[%s1583_s3 + $0xb0] sm:$0xff]  }
  0x44   :  { %572 = vmatpush1.bf16.msra.mxu0 %v1320_v52  ;;  %654 = vmatpush1.bf16.msra.mxu1 %v1321_v53  ;;  %v1393_v52 = vld [vmem:[%s1583_s3 + $0xf8] sm:$0xff]  }
  0x45   :  { %573 = vmatprep.subr.bf16.mxu0 %v1322_v54  ;;  %655 = vmatprep.subr.bf16.mxu1 %v1324_v55  ;;  %v1394_v53 = vld [vmem:[%s1583_s3 + $0x38] sm:$0xff]   ;;  %v123_v55 = vlaneseq }
  0x46   :  { %v1395_v54 = vld [vmem:[%s1583_s3 + $0xb8] sm:$0xff]  }
  0x48   :  { %574 = vmatpush1.bf16.msra.mxu0 %v1326_v56  ;;  %656 = vmatpush1.bf16.msra.mxu1 %v1327_v57  ;;  %v124_v56 = vshrl.u32 %v123_v55, 7 }
  0x49   :  { %575 = vmatprep.subr.bf16.mxu0 %v1328_v58  ;;  %657 = vmatprep.subr.bf16.mxu1 %v1330_v59  ;;  %v121_v59 = vld [vmem:[%s1582_s2] sm:$0xf] }
  0x4a   :  { %v125_v57 = vsub.s32 0, %v124_v56  ;;  %v133_v58 = vsub.s32 2, %v124_v56 }
  0x4c   :  { %576 = vmatpush1.bf16.msra.mxu0 %v1332_v60  ;;  %658 = vmatpush1.bf16.msra.mxu1 %v1333_v61  ;;  %v129_v60 = vsub.s32 1, %v124_v56  ;;  %v137_v61 = vsub.s32 3, %v124_v56 }
  0x4d   :  { %577 = vmatprep.subr.bf16.mxu0 %v1334_v62  ;;  %659 = vmatprep.subr.bf16.mxu1 %v1336_v63  ;;  %v126_v62 = vrot.slane %v121_v59, %v125_v57  ;;  %v134_v63 = vrot.slane %v121_v59, %v133_v58 }
  0x50   :  { %578 = vmatpush1.bf16.msra.mxu0 %v1338_v0  ;;  %660 = vmatpush1.bf16.msra.mxu1 %v1339_v1  ;;  %v130_v0 = vrot.slane %v121_v59, %v129_v60  ;;  %v138_v1 = vrot.slane %v121_v59, %v137_v61 }
  0x51   :  { %588 = vmatprep.subr.bf16.mxu0 %v1342_v2  ;;  %670 = vmatprep.subr.bf16.mxu1 %v1345_v4 }
  0x53   :  { %580 = vmatmul.mubr.bf16.vlgmr.msra.gmra.mrb[0].mxu0 %v38_v7  ;;  %662 = vmatmul.mubr.bf16.vlgmr.msra.gmra.mrb[0].mxu1 %v38_v7 }
  0x54   :  { %589 = vmatpush1.bf16.msra.mxu0 %v1340_v5  ;;  %671 = vmatpush1.bf16.msra.mxu1 %v1343_v6 }
  0x55   :  { %590 = vmatprep.subr.bf16.mxu0 %v1348_v8  ;;  %672 = vmatprep.subr.bf16.mxu1 %v1351_v9 }
  0x56   :  { %620 = vmatprep.mubr.bf16.mxu0 %v1423_v15  ;;  %702 = vmatprep.mubr.bf16.mxu1 %v1423_v15 }
  0x58   :  { %591 = vmatpush1.bf16.msra.mxu0 %v1346_v10  ;;  %673 = vmatpush1.bf16.msra.mxu1 %v1349_v11 }
  0x59   :  { %592 = vmatprep.subr.bf16.mxu0 %v1354_v12  ;;  %674 = vmatprep.subr.bf16.mxu1 %v1357_v13 }
  0x5c   :  { %593 = vmatpush1.bf16.msra.mxu0 %v1352_v14  ;;  %675 = vmatpush1.bf16.msra.mxu1 %v1355_v16 }
  0x5d   :  { %594 = vmatprep.subr.bf16.mxu0 %v1360_v17  ;;  %676 = vmatprep.subr.bf16.mxu1 %v1363_v18 }
  0x60   :  { %595 = vmatpush1.bf16.msra.mxu0 %v1358_v19  ;;  %677 = vmatpush1.bf16.msra.mxu1 %v1361_v20 }
  0x61   :  { %1184 = vmatprep.subr.bf16.mxu0 %v1364_v22  ;;  %1206 = vmatprep.subr.bf16.mxu1 %v1365_v23 }
  0x63   :  { %1149 = vmatmul.mubr.msk.bf16.vlgmr.msra.gmra.mrb[0].mxu0 %vm543_vm0, %v40_v26  ;;  %1150 = vmatmul.mubr.msk.bf16.vlgmr.msra.gmra.mrb[0].mxu1 %vm543_vm0, %v40_v26 }
  0x64   :  { %1185 = vmatpush3.bf16.msra.mxu0 %v1366_v24  ;;  %1207 = vmatpush3.bf16.msra.mxu1 %v1367_v25  ;;  %v1151_v24 = vld [vmem:[%s1584_s4] ss:$0 sm:$0xff] }
  0x65   :  { %1186 = vmatprep.subr.bf16.mxu0 %v1368_v27  ;;  %1208 = vmatprep.subr.bf16.mxu1 %v1369_v28 }
  0x68   :  { %1187 = vmatpush3.bf16.msra.mxu0 %v1370_v29  ;;  %1209 = vmatpush3.bf16.msra.mxu1 %v1371_v30 }
  0x69   :  { %1188 = vmatprep.subr.bf16.mxu0 %v1372_v31  ;;  %1210 = vmatprep.subr.bf16.mxu1 %v1373_v32 }
  0x6c   :  { %1189 = vmatpush3.bf16.msra.mxu0 %v1374_v33  ;;  %1211 = vmatpush3.bf16.msra.mxu1 %v1375_v34 }
  0x6d   :  { %1190 = vmatprep.subr.bf16.mxu0 %v1376_v35  ;;  %1212 = vmatprep.subr.bf16.mxu1 %v1377_v36 }
  0x70   :  { %1191 = vmatpush3.bf16.msra.mxu0 %v1378_v37  ;;  %1213 = vmatpush3.bf16.msra.mxu1 %v1379_v38 }
  0x71   :  { %1192 = vmatprep.subr.bf16.mxu0 %v1380_v39  ;;  %1214 = vmatprep.subr.bf16.mxu1 %v1381_v40 }
  0x74   :  { %1193 = vmatpush3.bf16.msra.mxu0 %v1382_v41  ;;  %1215 = vmatpush3.bf16.msra.mxu1 %v1383_v42 }
  0x75   :  { %1194 = vmatprep.subr.bf16.mxu0 %v1384_v43  ;;  %1216 = vmatprep.subr.bf16.mxu1 %v1385_v44 }
  0x78   :  { %1195 = vmatpush3.bf16.msra.mxu0 %v1386_v45  ;;  %1217 = vmatpush3.bf16.msra.mxu1 %v1387_v46 }
  0x79   :  { %1196 = vmatprep.subr.bf16.mxu0 %v1388_v47  ;;  %1218 = vmatprep.subr.bf16.mxu1 %v1389_v48 }
  0x7c   :  { %1197 = vmatpush3.bf16.msra.mxu0 %v1390_v49  ;;  %1219 = vmatpush3.bf16.msra.mxu1 %v1391_v50 }
  0x7d   :  { %1198 = vmatprep.subr.bf16.mxu0 %v1392_v51  ;;  %1220 = vmatprep.subr.bf16.mxu1 %v1393_v52 }
  0x80   :  { %1199 = vmatpush3.bf16.msra.mxu0 %v1394_v53  ;;  %1221 = vmatpush3.bf16.msra.mxu1 %v1395_v54 }
 0x136   :  { %v622_v2 = vpop.f32.mrb[0].mxu0  ;;  %v704_v3 = vpop.f32.mrb[0].mxu1 }
 0x137   :  { %v1228_v4 = vadd.f32 %v622_v2, %v126_v62  ;;  %v1230_v5 = vadd.f32 %v704_v3, %v134_v63  ;;  %v624_v6 = vpop.f32.mrb[1].mxu0  ;;  %v706_v7 = vpop.f32.mrb[1].mxu1 }
 0x138   :  { %v1229_v8 = vadd.f32 %v624_v6, %v130_v0  ;;  %v1231_v9 = vadd.f32 %v706_v7, %v138_v1  ;;  %v626_v10 = vpop.f32.mrb[2].mxu0  ;;  %v708_v11 = vpop.f32.mrb[2].mxu1 }
 0x139   :  { %v711_v12 = vmax.f32 %v1228_v4, 0.0  ;;  %v713_v13 = vmax.f32 %v1230_v5, 0.0  ;;  %v627_v14 = vpop.f32.mrb[3].mxu0  ;;  %v709_v15 = vpop.f32.mrb[3].mxu1 }
 0x13a   :  { %v712_v16 = vmax.f32 %v1229_v8, 0.0  ;;  %v714_v17 = vmax.f32 %v1231_v9, 0.0 }
 0x13b   :  { %v715_v20 = vpack.c.bf16 %v711_v12, %v711_v12  ;;  %v717_v21 = vpack.c.bf16 %v713_v13, %v713_v13 }
 0x13c   :  { %v716_v18 = vpack.c.bf16 %v712_v16, %v712_v16  ;;  %v718_v19 = vpack.c.bf16 %v714_v17, %v714_v17 }
 0x13e   :  { %1014 = vmatprep.mubr.bf16.mxu0 %v716_v18  ;;  %1054 = vmatprep.mubr.bf16.mxu1 %v718_v19 }
 0x13f   :  { %1015 = vmatmul.mubr.bf16.vlgmr.msra.gmra.mrb[4].mxu0 %v715_v20  ;;  %1055 = vmatmul.mubr.bf16.vlgmr.msra.gmra.mrb[4].mxu1 %v717_v21 }
 0x212   :  { %v1200_v22 = vpop.f32.mrb[4].mxu0  ;;  %v1222_v23 = vpop.f32.mrb[4].mxu1 }
 0x213   :  { %v1201_v25 = vpop.f32.mrb[5].mxu0  ;;  %v1223_v26 = vpop.f32.mrb[5].mxu1 }
 0x214   :  { %v1202_v27 = vadd.f32 %v1201_v25, %v1200_v22  ;;  %v1224_v28 = vadd.f32 %v1223_v26, %v1222_v23  ;;  %v1203_v29 = vpop.f32.mrb[6].mxu0  ;;  %v1225_v30 = vpop.f32.mrb[6].mxu1 }
 0x215   :  { %v1204_v31 = vpop.f32.mrb[7].mxu0  ;;  %v1226_v32 = vpop.f32.mrb[7].mxu1 }
 0x216   :  { %v1017_v33 = vadd.f32 %v1202_v27, %v1151_v24 }
 0x218   :  { %v1057_v34 = vadd.f32 %v1224_v28, %v1017_v33 }
 0x21a   :  { %1063 = vst.msk [vmem:[%s1585_s5] sm:$0xff] %vm1062_vm1, %v1057_v34 }
 0x21b   :  { %1068 = vsyncpa [#allocation3], 1 }

</bundles_post_ra>
